<compile_context>
chip_gen: v7x
topology: tpu7x:2x2x1
jax: 0.10.0
libtpu: 0.0.40
codegen_flags: <defaults>
</compile_context>

<pallas_src>
import functools

import jax
import jax.numpy as jnp
from jax.experimental import pallas as pl
from jax.experimental.pallas import tpu as pltpu


def _huber_elementwise(y_pred, y_true, clip_delta):
    # Always compute in f32 (safe on v5e: no bf16 VPU; free cast on v6e/v7x).
    td = y_true.astype(jnp.float32) - y_pred.astype(jnp.float32)
    td_abs = jnp.abs(td)
    quad = jnp.minimum(td_abs, clip_delta)          # clamp(max=clip_delta)
    lin = td_abs - quad
    return 0.5 * quad * quad + clip_delta * lin


def _fold_rows(loss):
    """(bt, D) -> (8, D) partial sums. bt % 8 == 0, so the reshape is
    (8,128)-tile aligned (free re-view) and the fold is plain VALU adds."""
    bt, d = loss.shape
    return loss.reshape(bt // 8, 8, d).sum(axis=0)


# ---------- scalar ('mean' / 'sum') reduction kernels ------------------------

def _sum_kernel(y_pred_ref, y_true_ref, out_ref, acc_ref, *, clip_delta):
    i = pl.program_id(1)

    @pl.when(i == 0)
    def _():
        acc_ref[...] = jnp.zeros_like(acc_ref)

    loss = _huber_elementwise(y_pred_ref[...], y_true_ref[...], clip_delta)
    acc_ref[...] += _fold_rows(loss)                # VALU-only per-step work

    @pl.when(i == pl.num_programs(1) - 1)
    def _():
        total = jnp.sum(acc_ref[...])               # one XLU reduce per slice
        out_ref[...] = jnp.full(out_ref.shape, total, dtype=jnp.float32)


def _sum_kernel_weighted(y_pred_ref, y_true_ref, w_ref, out_ref, acc_ref,
                         *, clip_delta):
    i = pl.program_id(1)

    @pl.when(i == 0)
    def _():
        acc_ref[...] = jnp.zeros_like(acc_ref)

    loss = _huber_elementwise(y_pred_ref[...], y_true_ref[...], clip_delta)
    loss = loss * w_ref[...].astype(jnp.float32)
    acc_ref[...] += _fold_rows(loss)

    @pl.when(i == pl.num_programs(1) - 1)
    def _():
        total = jnp.sum(acc_ref[...])
        out_ref[...] = jnp.full(out_ref.shape, total, dtype=jnp.float32)


# ---------- per-row ('none') reduction kernels --------------------------------

def _row_kernel(y_pred_ref, y_true_ref, out_ref, *, clip_delta, inv_d):
    loss = _huber_elementwise(y_pred_ref[...], y_true_ref[...], clip_delta)
    out_ref[...] = jnp.sum(loss, axis=1, keepdims=True) * inv_d


def _row_kernel_weighted(y_pred_ref, y_true_ref, w_ref, out_ref,
                         *, clip_delta, inv_d):
    loss = _huber_elementwise(y_pred_ref[...], y_true_ref[...], clip_delta)
    loss = loss * w_ref[...].astype(jnp.float32)
    out_ref[...] = jnp.sum(loss, axis=1, keepdims=True) * inv_d


# ---------- wrapper -----------------------------------------------------------

def _round_up(x, m):
    return -(-x // m) * m


def _pick_batch_tile(B, D, itemsize, target_bytes=1 << 20):
    """Rows per block so one input block is ~1 MiB in native dtype."""
    bt = max(8, (target_bytes // max(1, D * itemsize)) // 8 * 8)
    bt = min(bt, _round_up(B, 8))
    return int(bt)


def _pad_rows(x, rows):
    if x.shape[0] == rows:
        return x
    return jnp.pad(x, ((0, rows - x.shape[0]), (0, 0)))


def huber_loss(y_pred, y_true, weights=None, *, clip_delta=1.0,
               reduction="mean"):
    """Pallas TPU implementation of catalyst HuberLoss.forward."""
    reduction = reduction or "none"
    assert y_pred.shape == y_true.shape and y_pred.ndim == 2
    B, D = y_pred.shape
    itemsize = jnp.dtype(y_pred.dtype).itemsize
    clip_delta = float(clip_delta)

    if weights is not None:
        weights = jnp.broadcast_to(weights, y_pred.shape).astype(y_pred.dtype)

    bt = _pick_batch_tile(B, D, itemsize)
    n_steps = -(-B // bt)
    n_inputs = 2 if weights is None else 3
    flops_per_elt = 8 if weights is None else 9

    # ---------------- reduction == 'none': per-row means ----------------
    if reduction == "none":
        b_pad = n_steps * bt
        yp, yt = _pad_rows(y_pred, b_pad), _pad_rows(y_true, b_pad)
        blk = pl.BlockSpec((bt, D), lambda i: (i, 0))
        out_blk = pl.BlockSpec((bt, 1), lambda i: (i, 0))
        cost = pl.CostEstimate(
            flops=flops_per_elt * b_pad * D,
            transcendentals=0,
            bytes_accessed=n_inputs * b_pad * D * itemsize + b_pad * 4)
        if weights is None:
            kernel = functools.partial(_row_kernel, clip_delta=clip_delta,
                                       inv_d=1.0 / D)
            in_specs, args = [blk, blk], (yp, yt)
        else:
            w = _pad_rows(weights, b_pad)
            kernel = functools.partial(_row_kernel_weighted,
                                       clip_delta=clip_delta, inv_d=1.0 / D)
            in_specs, args = [blk, blk, blk], (yp, yt, w)
        out = pl.pallas_call(
            kernel,
            out_shape=jax.ShapeDtypeStruct((b_pad, 1), jnp.float32),
            grid_spec=pltpu.PrefetchScalarGridSpec(
                num_scalar_prefetch=0, grid=(n_steps,),
                in_specs=in_specs, out_specs=out_blk),
            compiler_params=pltpu.CompilerParams(
                dimension_semantics=("parallel",)),
            cost_estimate=cost,
        )(*args)
        return out[:B, 0]

    # ---------------- reduction in {'mean', 'sum'}: scalar ----------------
    if reduction == "mean":
        denom = float(B * D)       # mean over dim=1, then mean over batch
    elif reduction == "sum":
        denom = float(D)           # mean over dim=1, then sum over batch
    else:
        raise ValueError(f"unknown reduction: {reduction!r}")

    # Leading 'parallel' slice axis -> v7x megacore can use both TensorCores.
    num_slices = 2 if n_steps >= 2 else 1
    steps_per_slice = -(-n_steps // num_slices)
    b_pad = num_slices * steps_per_slice * bt
    yp, yt = _pad_rows(y_pred, b_pad), _pad_rows(y_true, b_pad)

    blk = pl.BlockSpec((bt, D), lambda s, i: (s * steps_per_slice + i, 0))
    out_blk = pl.BlockSpec((1, 8, 128), lambda s, i: (s, 0, 0))
    cost = pl.CostEstimate(
        flops=flops_per_elt * b_pad * D,
        transcendentals=0,
        bytes_accessed=n_inputs * b_pad * D * itemsize
                       + num_slices * 8 * 128 * 4)

    if weights is None:
        kernel = functools.partial(_sum_kernel, clip_delta=clip_delta)
        in_specs, args = [blk, blk], (yp, yt)
    else:
        w = _pad_rows(weights, b_pad)
        kernel = functools.partial(_sum_kernel_weighted, clip_delta=clip_delta)
        in_specs, args = [blk, blk, blk], (yp, yt, w)

    partials = pl.pallas_call(
        kernel,
        out_shape=jax.ShapeDtypeStruct((num_slices, 8, 128), jnp.float32),
        grid_spec=pltpu.PrefetchScalarGridSpec(
            num_scalar_prefetch=0,
            grid=(num_slices, steps_per_slice),
            in_specs=in_specs,
            out_specs=out_blk,
            scratch_shapes=[pltpu.VMEM((8, D), jnp.float32)]),
        compiler_params=pltpu.CompilerParams(
            dimension_semantics=("parallel", "arbitrary")),
        cost_estimate=cost,
    )(*args)

    # Tiny final combine (per-slice partials) + mean normalization in JAX.
    return jnp.sum(partials[:, 0, 0]) / denom


# ---------- pure-JAX reference ------------------------------------------------

def _huber_ref(y_pred, y_true, weights=None, clip_delta=1.0, reduction="mean"):
    td = y_true - y_pred
    ta = jnp.abs(td)
    quad = jnp.minimum(ta, clip_delta)
    lin = ta - quad
    loss = 0.5 * quad ** 2 + clip_delta * lin
    if weights is not None:
        loss = jnp.mean(loss * weights, axis=1)
    else:
        loss = jnp.mean(loss, axis=1)
    if reduction == "mean":
        return jnp.mean(loss)
    elif reduction == "sum":
        return jnp.sum(loss)
    return loss


if __name__ == "__main__":
    key = jax.random.PRNGKey(0)
    k1, k2, k3 = jax.random.split(key, 3)
    B, D = 16, 128
    y_pred = jax.random.normal(k1, (B, D), dtype=jnp.float32)
    y_true = jax.random.normal(k2, (B, D), dtype=jnp.float32)
    weights = jax.random.uniform(k3, (B, D), dtype=jnp.float32)

    # mean, unweighted
    out = jax.block_until_ready(huber_loss(y_pred, y_true, reduction="mean"))
    ref = _huber_ref(y_pred, y_true, None, 1.0, "mean")
    assert jnp.allclose(out, ref, rtol=1e-5, atol=1e-6), (out, ref)

    # sum, weighted, non-default clip_delta
    out = jax.block_until_ready(
        huber_loss(y_pred, y_true, weights, clip_delta=0.7, reduction="sum"))
    ref = _huber_ref(y_pred, y_true, weights, 0.7, "sum")
    assert jnp.allclose(out, ref, rtol=1e-5, atol=1e-5), (out, ref)

    # none, weighted (per-row vector output)
    out = jax.block_until_ready(
        huber_loss(y_pred, y_true, weights, reduction="none"))
    ref = _huber_ref(y_pred, y_true, weights, 1.0, "none")
    assert out.shape == (B,)
    assert jnp.allclose(out, ref, rtol=1e-5, atol=1e-5), (out, ref)

    # odd batch (padding / remainder path) with bf16 inputs streamed natively
    B2 = 10
    yp2 = jax.random.normal(k1, (B2, D), dtype=jnp.bfloat16)
    yt2 = jax.random.normal(k2, (B2, D), dtype=jnp.bfloat16)
    out = jax.block_until_ready(huber_loss(yp2, yt2, reduction="mean"))
    ref = _huber_ref(yp2.astype(jnp.float32), yt2.astype(jnp.float32),
                     None, 1.0, "mean")
    assert jnp.allclose(out, ref, rtol=1e-4, atol=1e-4), (out, ref)

    print("KERNEL_OK")
</pallas_src>

<mosaic_0001>
module attributes {stable_mosaic.version = 11 : i64} {
  func.func @_sum_kernel(%arg0: i32, %arg1: i32, %arg2: memref<16x128xf32, #tpu.memory_space<vmem>>, %arg3: memref<16x128xf32, #tpu.memory_space<vmem>>, %arg4: memref<1x8x128xf32, #tpu.memory_space<vmem>>, %arg5: memref<8x128xf32, #tpu.memory_space<vmem>>) attributes {dimension_semantics = [#tpu.dimension_semantics<parallel>, #tpu.dimension_semantics<arbitrary>], iteration_bounds = array<i64: 1, 1>, scalar_prefetch = 0 : i64, scratch_operands = 1 : i64, tpu.core_type = #tpu.core_type<tc>, window_params = [{transform_indices = @transform_0, window_bounds = array<i64: 16, 128>}, {transform_indices = @transform_1, window_bounds = array<i64: 16, 128>}, {transform_indices = @transform_2, window_bounds = array<i64: 1, 8, 128>}]} {
    %c0_i32 = arith.constant 0 : i32
    %0 = arith.cmpi eq, %arg1, %c0_i32 : i32
    %1 = arith.extui %0 : i1 to i32
    %c0_i32_0 = arith.constant 0 : i32
    %2 = arith.cmpi ne, %1, %c0_i32_0 : i32
    scf.if %2 {
      %cst_13 = arith.constant 0.000000e+00 : f32
      %24 = vector.broadcast %cst_13 : f32 to vector<8x128xf32>
      %c0_14 = arith.constant 0 : index
      %c0_15 = arith.constant 0 : index
      %25 = vector.load %arg5[%c0_14, %c0_15] : memref<8x128xf32, #tpu.memory_space<vmem>>, vector<8x128xf32>
      tpu.vector_store %arg5[%c0_14, %c0_15], %24 {strides = array<i32>} : memref<8x128xf32, #tpu.memory_space<vmem>>, vector<8x128xf32>,
    } else {
    }
    %c0 = arith.constant 0 : index
    %c0_1 = arith.constant 0 : index
    %3 = vector.load %arg2[%c0, %c0_1] : memref<16x128xf32, #tpu.memory_space<vmem>>, vector<16x128xf32>
    %c0_2 = arith.constant 0 : index
    %c0_3 = arith.constant 0 : index
    %4 = vector.load %arg3[%c0_2, %c0_3] : memref<16x128xf32, #tpu.memory_space<vmem>>, vector<16x128xf32>
    %5 = arith.subf %4, %3 : vector<16x128xf32>
    %6 = math.absf %5 : vector<16x128xf32>
    %cst = arith.constant 1.000000e+00 : f32
    %7 = vector.broadcast %cst : f32 to vector<16x128xf32>
    %8 = arith.minimumf %6, %7 : vector<16x128xf32>
    %9 = arith.subf %6, %8 : vector<16x128xf32>
    %cst_4 = arith.constant 5.000000e-01 : f32
    %10 = vector.broadcast %cst_4 : f32 to vector<16x128xf32>
    %11 = arith.mulf %10, %8 : vector<16x128xf32>
    %12 = arith.mulf %11, %8 : vector<16x128xf32>
    %cst_5 = arith.constant 1.000000e+00 : f32
    %13 = vector.broadcast %cst_5 : f32 to vector<16x128xf32>
    %14 = arith.mulf %13, %9 : vector<16x128xf32>
    %15 = arith.addf %12, %14 : vector<16x128xf32>
    %c0_6 = arith.constant 0 : index
    %c0_7 = arith.constant 0 : index
    %16 = vector.load %arg5[%c0_6, %c0_7] : memref<8x128xf32, #tpu.memory_space<vmem>>, vector<8x128xf32>
    %17 = vector.shape_cast %15 : vector<16x128xf32> to vector<2x8x128xf32>
    %cst_8 = arith.constant dense<0.000000e+00> : vector<8x128xf32>
    %18 = vector.multi_reduction <add>, %17, %cst_8 [0] : vector<2x8x128xf32> to vector<8x128xf32>
    %19 = arith.addf %16, %18 : vector<8x128xf32>
    %c0_9 = arith.constant 0 : index
    %c0_10 = arith.constant 0 : index
    %20 = vector.load %arg5[%c0_9, %c0_10] : memref<8x128xf32, #tpu.memory_space<vmem>>, vector<8x128xf32>
    tpu.vector_store %arg5[%c0_9, %c0_10], %19 {strides = array<i32>} : memref<8x128xf32, #tpu.memory_space<vmem>>, vector<8x128xf32>,
    %c0_i32_11 = arith.constant 0 : i32
    %21 = arith.cmpi eq, %arg1, %c0_i32_11 : i32
    %22 = arith.extui %21 : i1 to i32
    %c0_i32_12 = arith.constant 0 : i32
    %23 = arith.cmpi ne, %22, %c0_i32_12 : i32
    scf.if %23 {
      %c0_13 = arith.constant 0 : index
      %c0_14 = arith.constant 0 : index
      %24 = vector.load %arg5[%c0_13, %c0_14] : memref<8x128xf32, #tpu.memory_space<vmem>>, vector<8x128xf32>
      %25 = vector.shape_cast %24 : vector<8x128xf32> to vector<1x8x128xf32>
      %cst_15 = arith.constant dense<0.000000e+00> : vector<1xf32>
      %26 = vector.multi_reduction <add>, %25, %cst_15 [1, 2] : vector<1x8x128xf32> to vector<1xf32>
      %27 = vector.shape_cast %26 : vector<1xf32> to vector<1x1x1xf32>
      %28 = vector.extract %27[0, 0, 0] : f32 from vector<1x1x1xf32>
      %29 = vector.broadcast %28 : f32 to vector<1x8x128xf32>
      %c0_16 = arith.constant 0 : index
      %c0_17 = arith.constant 0 : index
      %c0_18 = arith.constant 0 : index
      %30 = vector.load %arg4[%c0_16, %c0_17, %c0_18] : memref<1x8x128xf32, #tpu.memory_space<vmem>>, vector<1x8x128xf32>
      tpu.vector_store %arg4[%c0_16, %c0_17, %c0_18], %29 {strides = array<i32>} : memref<1x8x128xf32, #tpu.memory_space<vmem>>, vector<1x8x128xf32>,
    } else {
    }
    return
  }
  func.func @transform_0(%arg0: i32, %arg1: i32) -> (i32, i32) {
    %c1_i32 = arith.constant 1 : i32
    %0 = arith.muli %arg0, %c1_i32 : i32
    %1 = arith.addi %0, %arg1 : i32
    %c0_i32 = arith.constant 0 : i32
    %c0_i32_0 = arith.constant 0 : i32
    return %1, %c0_i32 : i32, i32
  }
  func.func @transform_1(%arg0: i32, %arg1: i32) -> (i32, i32) {
    %c1_i32 = arith.constant 1 : i32
    %0 = arith.muli %arg0, %c1_i32 : i32
    %1 = arith.addi %0, %arg1 : i32
    %c0_i32 = arith.constant 0 : i32
    %c0_i32_0 = arith.constant 0 : i32
    return %1, %c0_i32 : i32, i32
  }
  func.func @transform_2(%arg0: i32, %arg1: i32) -> (i32, i32, i32) {
    %c0_i32 = arith.constant 0 : i32
    %c0_i32_0 = arith.constant 0 : i32
    %c0_i32_1 = arith.constant 0 : i32
    return %arg0, %c0_i32, %c0_i32_0 : i32, i32, i32
  }
}

</mosaic_0001>

<bundles_post_ra>
// kernel: tpu_custom_call.1
= control target key start
LH: loop header
LB: loop body
LE: loop exit
PB: predicated region body
PF: predicated region fallthrough
CT: control target
= control target key end

     0   :  { %7 = vsyncpa [#allocation4], 0  ;;  %s245_s0 = inlined_call_operand.hbm [shape: f32[16,128], index: 0, kind: input, shape index: {}]   ;;  %s246_s1 = inlined_call_operand.hbm [shape: f32[16,128], index: 1, kind: input, shape index: {}]   ;;  %s247_s2 = inlined_call_operand.hbm [shape: f32[1,8,128], index: 2, kind: output, shape index: {}]  }
   0x1   :  { %8 = vsyncpa [#allocation7], 0 }
   0x2   :  { %9 = vsyncpa [#allocation5], 0  ;;  %s189_s9 = smov [#allocation3]   ;;  %s117_s13 = scalar_lea.hbm %s245_s0, 256 }
   0x3   :  { %s19_s10 = sshll.u32 %s189_s9, 4  ;;  %p118_p0 = scmp.ne.s32.totalorder %s245_s0, %s117_s13  ;;  %s20_s10 = int_to_ptr.vmem [resolvable:$true] %s19_s10 }
   0x4   :  { %p121_p1 = scmp.lt.u32.totalorder %s117_s13, %s245_s0 }
   0x6   :  { %p123_p2 = pnand %p121_p1, %p118_p0 }
   0x8   :  { %126 = shalt.err (!%p123_p2)
}
   0x9   :  { %s127_s18 = scalar_lea.vmem %s20_s10, 256  ;;  %p132_p4 = scmp.lt.s32.totalorder %s20_s10, %s20_s10 }
   0xa   :  { %p128_p3 = scmp.ne.s32.totalorder %s20_s10, %s127_s18  ;;  %p133_p5 = scmp.lt.s32.totalorder %s127_s18, %s127_s18 }
   0xc   :  { %p134_p6 = por %p133_p5, %p132_p4 }
   0xe   :  { %p135_p7 = pnand %p134_p6, %p128_p3 }
  0x10   :  { %138 = shalt.err (!%p135_p7)
}
  0x11   :  { %s190_s19 = smov 128   ;;  %s191_s20 = smov 8  }
  0x12   :  { %25 = dma.hbm_to_vmem [thread:$0]  %s245_s0, 256, %s20_s10, [#allocation4], %s190_s19, %s190_s19, %s191_s20  }
  0x13   :  { %s192_s23 = smov [#allocation6]   ;;  %s139_s27 = scalar_lea.hbm %s246_s1, 256 }
  0x14   :  { %s35_s24 = sshll.u32 %s192_s23, 4  ;;  %p140_p8 = scmp.ne.s32.totalorder %s246_s1, %s139_s27  ;;  %s36_s24 = int_to_ptr.vmem [resolvable:$true] %s35_s24 }
  0x15   :  { %p143_p9 = scmp.lt.u32.totalorder %s139_s27, %s246_s1 }
  0x17   :  { %p145_p10 = pnand %p143_p9, %p140_p8 }
  0x19   :  { %148 = shalt.err (!%p145_p10)
}
  0x1a   :  { %s149_s4 = scalar_lea.vmem %s36_s24, 256  ;;  %p154_p12 = scmp.lt.s32.totalorder %s36_s24, %s36_s24 }
  0x1b   :  { %p150_p11 = scmp.ne.s32.totalorder %s36_s24, %s149_s4  ;;  %p155_p13 = scmp.lt.s32.totalorder %s149_s4, %s149_s4 }
  0x1d   :  { %p156_p0 = por %p155_p13, %p154_p12 }
  0x1f   :  { %p157_p1 = pnand %p156_p0, %p150_p11 }
  0x21   :  { %160 = shalt.err (!%p157_p1)
}
  0x22   :  { %41 = dma.hbm_to_vmem [thread:$0]  %s246_s1, 256, %s36_s24, [#allocation7], %s190_s19, %s190_s19, %s191_s20  }
  0x23   :  { %183 = dma.done.wait [#allocation4], 256  }
  0x24   :  { %184 = vsyncadd [#allocation4], 4294967040 }
  0x25   :  { %185 = dma.done.wait [#allocation7], 256  }
  0x26   :  { %186 = vsyncadd [#allocation7], 4294967040  ;;  %v57_v0 = vld [vmem:[#allocation3] sm:$0xff]  ;;  %v58_v1 = vld [vmem:[#allocation3 + $0x8] sm:$0xff]  ;;  %s193_s1 = smov [#allocation8]  }
  0x27   :  { %v59_v2 = vld [vmem:[#allocation6] sm:$0xff]  ;;  %v60_v3 = vld [vmem:[#allocation6 + $0x8] sm:$0xff]  ;;  %s100_s6 = sshll.u32 %s193_s1, 4  ;;  %s101_s6 = int_to_ptr.vmem [resolvable:$true] %s100_s6 }
  0x28   :  { %v61_v4 = vsub.f32 %v59_v2, %v57_v0  ;;  %v62_v5 = vsub.f32 %v60_v3, %v58_v1  ;;  %s161_s8 = scalar_lea.vmem %s101_s6, 128  ;;  %p166_p3 = scmp.lt.s32.totalorder %s101_s6, %s101_s6 }
  0x29   :  { %p162_p2 = scmp.ne.s32.totalorder %s101_s6, %s161_s8  ;;  %p167_p4 = scmp.lt.s32.totalorder %s161_s8, %s161_s8 }
  0x2a   :  { %v63_v6 = vand.u32 2147483647, %v61_v4  ;;  %v64_v7 = vand.u32 2147483647, %v62_v5 }
  0x2b   :  { %p168_p5 = por %p167_p4, %p166_p3 }
  0x2c   :  { %v65_v8 = vmin.f32 %v63_v6, 1.0  ;;  %v66_v9 = vmin.f32 %v64_v7, 1.0 }
  0x2d   :  { %p169_p6 = pnand %p168_p5, %p162_p2 }
  0x2e   :  { %v67_v10 = vsub.f32 %v63_v6, %v65_v8  ;;  %v69_v11 = vmul.f32 0.5, %v65_v8  ;;  %v68_v12 = vsub.f32 %v64_v7, %v66_v9  ;;  %v70_v13 = vmul.f32 0.5, %v66_v9 }
  0x30   :  { %v71_v14 = vmul.f32 %v69_v11, %v65_v8  ;;  %v72_v15 = vmul.f32 %v70_v13, %v66_v9 }
  0x32   :  { %v73_v16 = vadd.f32 %v71_v14, %v67_v10  ;;  %v74_v17 = vadd.f32 %v72_v15, %v68_v12 }
  0x34   :  { %v76_v18 = vadd.f32 %v74_v17, %v73_v16 }
  0x36   :  { %83 = vadd.xlane.f32.xlu0 %v76_v18 }
  0xc3   :  { %v84_v19 = vpop.xlane.xlu0 %83 }
  0xc4   :  { %v85_v20 = vrot.slane %v84_v19, 4 }
  0xc6   :  { %v86_v21 = vadd.f32 %v85_v20, %v84_v19 }
  0xc8   :  { %v87_v22 = vrot.slane %v86_v21, 2 }
  0xca   :  { %v88_v23 = vadd.f32 %v87_v22, %v86_v21 }
  0xcc   :  { %v89_v24 = vrot.slane %v88_v23, 1 }
  0xce   :  { %v90_v25 = vadd.f32 %v89_v24, %v88_v23 }
  0xd0   :  { %110 = vpush %v90_v25 }
 0x101   :  { %s111_s7 = spop %110 }
 0x102   :  { %v92_v26 = vstv %s111_s7 }
 0x103   :  { %93 = vst [vmem:[#allocation8] sm:$0xff] %v92_v26 }
 0x104   :  { %172 = shalt.err (!%p169_p6)
}
 0x105   :  { %s173_s11 = scalar_lea.hbm %s247_s2, 128 }
 0x106   :  { %p174_p7 = scmp.ne.s32.totalorder %s247_s2, %s173_s11  ;;  %p177_p8 = scmp.lt.u32.totalorder %s173_s11, %s247_s2 }
 0x108   :  { %p179_p9 = pnand %p177_p8, %p174_p7 }
 0x10a   :  { %182 = shalt.err (!%p179_p9)
}
 0x10b   :  { %103 = dma.vmem_to_hbm [thread:$0]  %s101_s6, 128, %s247_s2, [#allocation5]  }
 0x10c   :  { %187 = dma.done.wait [#allocation5], 128  }
 0x10d   :  { %188 = vsyncadd [#allocation5], 4294967168 }
 0x10e   :  { %107 = vsyncpa [#allocation4], 1 }
 0x10f   :  { %108 = vsyncpa [#allocation7], 1 }
 0x110   :  { %109 = vsyncpa [#allocation5], 1 }

</bundles_post_ra>
